<compile_context>
chip_gen: v7x
topology: tpu7x:2x2x1
jax: 0.10.0
libtpu: 0.0.40
codegen_flags: <defaults>
</compile_context>

<pallas_src>
import jax
import jax.numpy as jnp
from jax.experimental import pallas as pl
from jax.experimental.pallas import tpu as pltpu

K_IN = 28 * 28        # 784 (multiple of 8/16 — no K padding needed)
H_PAD = 256           # hidden 200 -> 256 (2*128 lanes)
O_PAD = 128           # W3/b3 lane-padded to 128 for the MXU
O_OUT = 10            # logical output width


# ---------------------------------------------------------------------------
# Kernel
# ---------------------------------------------------------------------------
def mlp_kernel(x_ref, w1_ref, b1_ref, w2_ref, b2_ref, w3_ref, b3_ref, o_ref):
    # x_ref: (TB, 784) f32 ; weights bf16 ; biases f32 ; o_ref: (TB, 10) f32
    x = x_ref[...].astype(jnp.bfloat16)                                   # cast on-tile

    h1 = jnp.dot(x, w1_ref[...], preferred_element_type=jnp.float32)     # MXU, f32 acc
    h1 = jnp.maximum(h1 + b1_ref[...], 0.0).astype(jnp.bfloat16)         # f32 VPU

    h2 = jnp.dot(h1, w2_ref[...], preferred_element_type=jnp.float32)
    h2 = jnp.maximum(h2 + b2_ref[...], 0.0).astype(jnp.bfloat16)

    y = jnp.dot(h2, w3_ref[...], preferred_element_type=jnp.float32) + b3_ref[...]
    o_ref[...] = y[:, : o_ref.shape[1]]                                   # (TB, 10)


# ---------------------------------------------------------------------------
# Helpers
# ---------------------------------------------------------------------------
def _round_up(n, m):
    return ((n + m - 1) // m) * m


def _pad2(a, rows, cols):
    a = jnp.asarray(a, jnp.float32)
    return jnp.pad(a, ((0, rows - a.shape[0]), (0, cols - a.shape[1])))


def prepare_params(params):
    """One-time: pad weights lane-dense and cast MXU operands to bf16."""
    w1, b1, w2, b2, w3, b3 = params
    b1 = jnp.asarray(b1).reshape(1, -1)
    b2 = jnp.asarray(b2).reshape(1, -1)
    b3 = jnp.asarray(b3).reshape(1, -1)
    w1p = _pad2(w1, K_IN, H_PAD).astype(jnp.bfloat16)     # (784, 256)
    b1p = _pad2(b1, 1, H_PAD)                             # (1, 256) f32
    w2p = _pad2(w2, H_PAD, H_PAD).astype(jnp.bfloat16)    # (256, 256)
    b2p = _pad2(b2, 1, H_PAD)                             # (1, 256) f32
    w3p = _pad2(w3, H_PAD, O_PAD).astype(jnp.bfloat16)    # (256, 128)
    b3p = _pad2(b3, 1, O_PAD)                             # (1, 128) f32
    return (w1p, b1p, w2p, b2p, w3p, b3p)


def _pick_tiling(B, tb):
    """Balanced batch tiles; >=2 (even) grid steps for large B (v7x dual-TC)."""
    tb = max(8, min(int(tb), 2048))            # cap keeps working set VMEM-friendly
    num_tiles = pl.cdiv(B, tb)
    if B >= 512:
        if num_tiles < 2:
            num_tiles = 2
        elif num_tiles % 2:
            num_tiles += 1
    num_tiles = min(num_tiles, pl.cdiv(B, 8))
    TB = _round_up(pl.cdiv(B, num_tiles), 8)
    # Guarantee the last tile is non-empty (never triggers in practice).
    while num_tiles > 1 and (num_tiles - 1) * TB >= B:
        num_tiles -= 1
        TB = _round_up(pl.cdiv(B, num_tiles), 8)
    return num_tiles, TB


# ---------------------------------------------------------------------------
# Forward
# ---------------------------------------------------------------------------
def fake_net_forward(x, prepared_params, tb=1024):
    """x: (B, 1, 28, 28) or (B, 784) float32. Returns (B, 10) float32."""
    w1p, b1p, w2p, b2p, w3p, b3p = prepared_params
    B = x.shape[0]
    x2d = x.reshape(B, -1).astype(jnp.float32)            # (B, 784), no HBM copy/pad

    num_tiles, TB = _pick_tiling(B, tb)
    grid = (num_tiles,)

    # VMEM working-set estimate -> explicit limit (>=32 MiB beats v5e's 16 MiB
    # scoped default; <=48 MiB stays inside v7x's 64 MiB physical VMEM).
    vmem_bytes = (
        2 * TB * K_IN * 4                                  # x double-buffer (f32)
        + 2 * TB * O_OUT * 4                               # out double-buffer
        + 2 * 2 * (K_IN * H_PAD + H_PAD * H_PAD + H_PAD * O_PAD)   # bf16 weights
        + 2 * 4 * (H_PAD + H_PAD + O_PAD)                  # f32 biases
        + 6 * TB * H_PAD * 4                               # h1/h2/y intermediates
    )
    vmem_limit = int(min(max(vmem_bytes * 3 // 2, 32 << 20), 48 << 20))

    # Advisory cost estimate (consistent: padded FLOPs, actual HBM bytes).
    flops = 2 * num_tiles * TB * (K_IN * H_PAD + H_PAD * H_PAD + H_PAD * O_PAD)
    bytes_accessed = (
        B * K_IN * 4 + B * O_OUT * 4
        + (K_IN * H_PAD + H_PAD * H_PAD + H_PAD * O_PAD) * 2
        + (H_PAD + H_PAD + O_PAD) * 4
    )
    cost = pl.CostEstimate(flops=int(flops), transcendentals=0,
                           bytes_accessed=int(bytes_accessed))

    resident = lambda shape: pl.BlockSpec(shape, lambda i: (0, 0))

    out = pl.pallas_call(
        mlp_kernel,
        out_shape=jax.ShapeDtypeStruct((B, O_OUT), jnp.float32),
        grid=grid,
        in_specs=[
            pl.BlockSpec((TB, K_IN), lambda i: (i, 0)),    # x: tiled over batch
            resident((K_IN, H_PAD)), resident((1, H_PAD)), # W1, b1 (VMEM-resident)
            resident((H_PAD, H_PAD)), resident((1, H_PAD)),# W2, b2
            resident((H_PAD, O_PAD)), resident((1, O_PAD)),# W3, b3
        ],
        out_specs=pl.BlockSpec((TB, O_OUT), lambda i: (i, 0)),
        compiler_params=pltpu.CompilerParams(
            dimension_semantics=("parallel",),
            vmem_limit_bytes=vmem_limit,
        ),
        cost_estimate=cost,
    )(x2d, w1p, b1p, w2p, b2p, w3p, b3p)

    return out


# ---------------------------------------------------------------------------
# Init + reference
# ---------------------------------------------------------------------------
def init_params(key):
    """nn.Linear default init: U(-1/sqrt(fan_in), 1/sqrt(fan_in)); W stored (in, out)."""
    def linear(key, fan_in, fan_out):
        kw, kb = jax.random.split(key)
        bound = 1.0 / jnp.sqrt(jnp.float32(fan_in))
        w = jax.random.uniform(kw, (fan_in, fan_out), jnp.float32, -bound, bound)
        b = jax.random.uniform(kb, (1, fan_out), jnp.float32, -bound, bound)
        return w, b

    k1, k2, k3 = jax.random.split(key, 3)
    w1, b1 = linear(k1, 28 * 28, 200)
    w2, b2 = linear(k2, 200, 200)
    w3, b3 = linear(k3, 200, 10)
    return (w1, b1, w2, b2, w3, b3)


def reference_forward(x, params):
    w1, b1, w2, b2, w3, b3 = params
    h = x.reshape(x.shape[0], -1).astype(jnp.float32)
    h = jnp.maximum(h @ w1 + b1, 0.0)
    h = jnp.maximum(h @ w2 + b2, 0.0)
    return h @ w3 + b3


# ---------------------------------------------------------------------------
if __name__ == "__main__":
    key = jax.random.PRNGKey(0)
    k_params, k_x1, k_x2 = jax.random.split(key, 3)
    params = init_params(k_params)
    prepped = prepare_params(params)          # one-time weight pad/cast

    fwd = jax.jit(lambda xx, pp: fake_net_forward(xx, pp))

    # Small MNIST-like NCHW input (single grid step, ragged partial tile).
    x_small = jax.random.normal(k_x1, (2, 1, 28, 28), jnp.float32)
    out_small = jax.block_until_ready(fwd(x_small, prepped))
    ref_small = reference_forward(x_small, params)
    assert out_small.shape == (2, 10)
    assert jnp.allclose(out_small, ref_small, atol=5e-2, rtol=5e-2), \
        float(jnp.max(jnp.abs(out_small - ref_small)))

    # Larger batch: exercises the >=2-step grid (v7x dual-TC) + ragged last tile.
    x_big = jax.random.normal(k_x2, (600, 1, 28, 28), jnp.float32)
    out_big = jax.block_until_ready(fwd(x_big, prepped))
    ref_big = reference_forward(x_big, params)
    assert out_big.shape == (600, 10)
    assert jnp.allclose(out_big, ref_big, atol=5e-2, rtol=5e-2), \
        float(jnp.max(jnp.abs(out_big - ref_big)))

    print("KERNEL_OK")
</pallas_src>

<mosaic_0001>
module attributes {stable_mosaic.version = 11 : i64} {
  func.func @mlp_kernel(%arg0: i32, %arg1: memref<8x784xf32, #tpu.memory_space<vmem>>, %arg2: memref<784x256xbf16, #tpu.memory_space<vmem>>, %arg3: memref<1x256xf32, #tpu.memory_space<vmem>>, %arg4: memref<256x256xbf16, #tpu.memory_space<vmem>>, %arg5: memref<1x256xf32, #tpu.memory_space<vmem>>, %arg6: memref<256x128xbf16, #tpu.memory_space<vmem>>, %arg7: memref<1x128xf32, #tpu.memory_space<vmem>>, %arg8: memref<8x10xf32, #tpu.memory_space<vmem>>) attributes {dimension_semantics = [#tpu.dimension_semantics<parallel>], iteration_bounds = array<i64: 1>, scalar_prefetch = 0 : i64, scratch_operands = 0 : i64, tpu.core_type = #tpu.core_type<tc>, window_params = [{transform_indices = @transform_0, window_bounds = array<i64: 8, 784>}, {pipeline_mode = #tpu.pipeline_mode<synchronous>, transform_indices = @transform_1, window_bounds = array<i64: 784, 256>}, {pipeline_mode = #tpu.pipeline_mode<synchronous>, transform_indices = @transform_2, window_bounds = array<i64: 1, 256>}, {pipeline_mode = #tpu.pipeline_mode<synchronous>, transform_indices = @transform_3, window_bounds = array<i64: 256, 256>}, {pipeline_mode = #tpu.pipeline_mode<synchronous>, transform_indices = @transform_4, window_bounds = array<i64: 1, 256>}, {pipeline_mode = #tpu.pipeline_mode<synchronous>, transform_indices = @transform_5, window_bounds = array<i64: 256, 128>}, {pipeline_mode = #tpu.pipeline_mode<synchronous>, transform_indices = @transform_6, window_bounds = array<i64: 1, 128>}, {transform_indices = @transform_7, window_bounds = array<i64: 8, 10>}]} {
    %c0 = arith.constant 0 : index
    %c0_0 = arith.constant 0 : index
    %0 = vector.load %arg1[%c0, %c0_0] : memref<8x784xf32, #tpu.memory_space<vmem>>, vector<8x784xf32>
    %1 = arith.truncf %0 : vector<8x784xf32> to vector<8x784xbf16>
    %c0_1 = arith.constant 0 : index
    %c0_2 = arith.constant 0 : index
    %2 = vector.load %arg2[%c0_1, %c0_2] : memref<784x256xbf16, #tpu.memory_space<vmem>>, vector<784x256xbf16>
    %cst = arith.constant dense<0.000000e+00> : vector<8x256xf32>
    %3 = tpu.matmul %1, %2, %cst {dimension_numbers = #tpu.dot_dimension_numbers<[1], [0], [0], [1], [0, 0, 1, 1], [], []>} : vector<8x784xbf16>, vector<784x256xbf16>, vector<8x256xf32> -> vector<8x256xf32>
    %c0_3 = arith.constant 0 : index
    %c0_4 = arith.constant 0 : index
    %4 = vector.load %arg3[%c0_3, %c0_4] : memref<1x256xf32, #tpu.memory_space<vmem>>, vector<1x256xf32>
    %5 = vector.broadcast %4 : vector<1x256xf32> to vector<8x256xf32>
    %6 = arith.addf %3, %5 : vector<8x256xf32>
    %cst_5 = arith.constant 0.000000e+00 : f32
    %7 = vector.broadcast %cst_5 : f32 to vector<8x256xf32>
    %8 = arith.maximumf %6, %7 : vector<8x256xf32>
    %9 = arith.truncf %8 : vector<8x256xf32> to vector<8x256xbf16>
    %c0_6 = arith.constant 0 : index
    %c0_7 = arith.constant 0 : index
    %10 = vector.load %arg4[%c0_6, %c0_7] : memref<256x256xbf16, #tpu.memory_space<vmem>>, vector<256x256xbf16>
    %cst_8 = arith.constant dense<0.000000e+00> : vector<8x256xf32>
    %11 = tpu.matmul %9, %10, %cst_8 {dimension_numbers = #tpu.dot_dimension_numbers<[1], [0], [0], [1], [0, 0, 1, 1], [], []>} : vector<8x256xbf16>, vector<256x256xbf16>, vector<8x256xf32> -> vector<8x256xf32>
    %c0_9 = arith.constant 0 : index
    %c0_10 = arith.constant 0 : index
    %12 = vector.load %arg5[%c0_9, %c0_10] : memref<1x256xf32, #tpu.memory_space<vmem>>, vector<1x256xf32>
    %13 = vector.broadcast %12 : vector<1x256xf32> to vector<8x256xf32>
    %14 = arith.addf %11, %13 : vector<8x256xf32>
    %cst_11 = arith.constant 0.000000e+00 : f32
    %15 = vector.broadcast %cst_11 : f32 to vector<8x256xf32>
    %16 = arith.maximumf %14, %15 : vector<8x256xf32>
    %17 = arith.truncf %16 : vector<8x256xf32> to vector<8x256xbf16>
    %c0_12 = arith.constant 0 : index
    %c0_13 = arith.constant 0 : index
    %18 = vector.load %arg6[%c0_12, %c0_13] : memref<256x128xbf16, #tpu.memory_space<vmem>>, vector<256x128xbf16>
    %cst_14 = arith.constant dense<0.000000e+00> : vector<8x128xf32>
    %19 = tpu.matmul %17, %18, %cst_14 {dimension_numbers = #tpu.dot_dimension_numbers<[1], [0], [0], [1], [0, 0, 1, 1], [], []>} : vector<8x256xbf16>, vector<256x128xbf16>, vector<8x128xf32> -> vector<8x128xf32>
    %c0_15 = arith.constant 0 : index
    %c0_16 = arith.constant 0 : index
    %20 = vector.load %arg7[%c0_15, %c0_16] : memref<1x128xf32, #tpu.memory_space<vmem>>, vector<1x128xf32>
    %21 = vector.broadcast %20 : vector<1x128xf32> to vector<8x128xf32>
    %22 = arith.addf %19, %21 : vector<8x128xf32>
    %23 = vector.extract_strided_slice %22 {offsets = [0, 0], sizes = [8, 10], strides = [1, 1]} : vector<8x128xf32> to vector<8x10xf32>
    %c0_17 = arith.constant 0 : index
    %c0_18 = arith.constant 0 : index
    %24 = vector.load %arg8[%c0_17, %c0_18] : memref<8x10xf32, #tpu.memory_space<vmem>>, vector<8x10xf32>
    tpu.vector_store %arg8[%c0_17, %c0_18], %23 {strides = array<i32>} : memref<8x10xf32, #tpu.memory_space<vmem>>, vector<8x10xf32>,
    return
  }
  func.func @transform_0(%arg0: i32) -> (i32, i32) {
    %c0_i32 = arith.constant 0 : i32
    %c0_i32_0 = arith.constant 0 : i32
    return %arg0, %c0_i32 : i32, i32
  }
  func.func @transform_1(%arg0: i32) -> (i32, i32) {
    %c0_i32 = arith.constant 0 : i32
    %c0_i32_0 = arith.constant 0 : i32
    %c0_i32_1 = arith.constant 0 : i32
    return %c0_i32, %c0_i32_0 : i32, i32
  }
  func.func @transform_2(%arg0: i32) -> (i32, i32) {
    %c0_i32 = arith.constant 0 : i32
    %c0_i32_0 = arith.constant 0 : i32
    %c0_i32_1 = arith.constant 0 : i32
    return %c0_i32, %c0_i32_0 : i32, i32
  }
  func.func @transform_3(%arg0: i32) -> (i32, i32) {
    %c0_i32 = arith.constant 0 : i32
    %c0_i32_0 = arith.constant 0 : i32
    %c0_i32_1 = arith.constant 0 : i32
    return %c0_i32, %c0_i32_0 : i32, i32
  }
  func.func @transform_4(%arg0: i32) -> (i32, i32) {
    %c0_i32 = arith.constant 0 : i32
    %c0_i32_0 = arith.constant 0 : i32
    %c0_i32_1 = arith.constant 0 : i32
    return %c0_i32, %c0_i32_0 : i32, i32
  }
  func.func @transform_5(%arg0: i32) -> (i32, i32) {
    %c0_i32 = arith.constant 0 : i32
    %c0_i32_0 = arith.constant 0 : i32
    %c0_i32_1 = arith.constant 0 : i32
    return %c0_i32, %c0_i32_0 : i32, i32
  }
  func.func @transform_6(%arg0: i32) -> (i32, i32) {
    %c0_i32 = arith.constant 0 : i32
    %c0_i32_0 = arith.constant 0 : i32
    %c0_i32_1 = arith.constant 0 : i32
    return %c0_i32, %c0_i32_0 : i32, i32
  }
  func.func @transform_7(%arg0: i32) -> (i32, i32) {
    %c0_i32 = arith.constant 0 : i32
    %c0_i32_0 = arith.constant 0 : i32
    return %arg0, %c0_i32 : i32, i32
  }
}

</mosaic_0001>

<bundles_post_ra>
// kernel: _lambda_.1
= control target key start
LH: loop header
LB: loop body
LE: loop exit
PB: predicated region body
PF: predicated region fallthrough
CT: control target
= control target key end

     0   :  { %12 = vsyncpa [#allocation3], 0  ;;  %s2056_s0 = inlined_call_operand.vmem [shape: f32[2,784], index: 0, kind: input, shape index: {}]   ;;  %s2057_s1 = inlined_call_operand.hbm [shape: bf16[784,256], index: 1, kind: input, shape index: {}]   ;;  %s2058_s2 = inlined_call_operand.vmem [shape: f32[1,256], index: 2, kind: input, shape index: {}]   ;;  %s2059_s3 = inlined_call_operand.hbm [shape: bf16[256,256], index: 3, kind: input, shape index: {}]   ;;  %s2060_s4 = inlined_call_operand.vmem [shape: f32[1,256], index: 4, kind: input, shape index: {}]   ;;  %s2061_s5 = inlined_call_operand.vmem [shape: bf16[256,128], index: 5, kind: input, shape index: {}]   ;;  %s2062_s6 = inlined_call_operand.vmem [shape: f32[1,128], index: 6, kind: input, shape index: {}]   ;;  %s2063_s7 = inlined_call_operand.hbm [shape: f32[2,10], index: 7, kind: output, shape index: {}]  }
   0x1   :  { %13 = vsyncpa [#allocation6], 0 }
   0x2   :  { %14 = vsyncpa [#allocation4], 0  ;;  %s1859_s24 = smov [#allocation2]   ;;  %s1787_s28 = scalar_lea.hbm %s2057_s1, 12544 }
   0x3   :  { %s22_s25 = sshll.u32 %s1859_s24, 4  ;;  %p1788_p0 = scmp.ne.s32.totalorder %s2057_s1, %s1787_s28  ;;  %s23_s25 = int_to_ptr.vmem [resolvable:$true] %s22_s25 }
   0x4   :  { %p1791_p1 = scmp.lt.u32.totalorder %s1787_s28, %s2057_s1 }
   0x6   :  { %p1793_p2 = pnand %p1791_p1, %p1788_p0 }
   0x8   :  { %1796 = shalt.err (!%p1793_p2)
}
   0x9   :  { %s1797_s10 = scalar_lea.vmem %s23_s25, 12544  ;;  %p1802_p4 = scmp.lt.s32.totalorder %s23_s25, %s23_s25 }
   0xa   :  { %p1798_p3 = scmp.ne.s32.totalorder %s23_s25, %s1797_s10  ;;  %p1803_p5 = scmp.lt.s32.totalorder %s1797_s10, %s1797_s10 }
   0xc   :  { %p1804_p6 = por %p1803_p5, %p1802_p4 }
   0xe   :  { %p1805_p7 = pnand %p1804_p6, %p1798_p3 }
  0x10   :  { %1808 = shalt.err (!%p1805_p7)
}
  0x11   :  { %s1860_s11 = smov 128   ;;  %s1861_s12 = smov 8  }
  0x12   :  { %28 = dma.hbm_to_vmem [thread:$0]  %s2057_s1, 12544, %s23_s25, [#allocation3], %s1860_s11, %s1860_s11, %s1861_s12  }
  0x13   :  { %s1862_s15 = smov [#allocation5]   ;;  %s1809_s19 = scalar_lea.hbm %s2059_s3, 4096 }
  0x14   :  { %s36_s16 = sshll.u32 %s1862_s15, 4  ;;  %p1810_p8 = scmp.ne.s32.totalorder %s2059_s3, %s1809_s19  ;;  %s37_s16 = int_to_ptr.vmem [resolvable:$true] %s36_s16 }
  0x15   :  { %p1813_p9 = scmp.lt.u32.totalorder %s1809_s19, %s2059_s3 }
  0x17   :  { %p1815_p10 = pnand %p1813_p9, %p1810_p8 }
  0x19   :  { %1818 = shalt.err (!%p1815_p10)
}
  0x1a   :  { %s1819_s24 = scalar_lea.vmem %s37_s16, 4096  ;;  %p1824_p12 = scmp.lt.s32.totalorder %s37_s16, %s37_s16 }
  0x1b   :  { %p1820_p11 = scmp.ne.s32.totalorder %s37_s16, %s1819_s24  ;;  %p1825_p13 = scmp.lt.s32.totalorder %s1819_s24, %s1819_s24 }
  0x1d   :  { %p1826_p0 = por %p1825_p13, %p1824_p12 }
  0x1f   :  { %p1827_p1 = pnand %p1826_p0, %p1820_p11 }
  0x21   :  { %1830 = shalt.err (!%p1827_p1)
}
  0x22   :  { %42 = dma.hbm_to_vmem [thread:$0]  %s2059_s3, 4096, %s37_s16, [#allocation6], %s1860_s11, %s1860_s11, %s1861_s12  }
  0x23   :  { %1853 = dma.done.wait [#allocation3], 12544  }
  0x24   :  { %1854 = vsyncadd [#allocation3], 4294954752 }
  0x25   :  { %1855 = dma.done.wait [#allocation6], 4096  }
  0x26   :  { %1856 = vsyncadd [#allocation6], 4294963200  ;;  %v1564_v0 = vld [vmem:[#allocation2 + $0x104] ss:$8 sps:$4 sm:$0xff]   ;;  %v1566_v1 = vld [vmem:[#allocation2 + $0x100] ss:$8 sps:$4 sm:$0xff]   ;;  %v79_v11 = vlaneseq }
  0x27   :  { %802 = vmatprep.subr.bf16.mxu0 %v1564_v0  ;;  %v1567_v2 = vld [vmem:[#allocation2 + $0x114] ss:$8 sps:$4 sm:$0xff]   ;;  %v1569_v3 = vld [vmem:[#allocation2 + $0x110] ss:$8 sps:$4 sm:$0xff]   ;;  %v1570_v4 = vld [vmem:[#allocation2 + $0x124] ss:$8 sps:$4 sm:$0xff]  }
  0x28   :  { %803 = vmatpush1.bf16.msra.mxu0 %v1566_v1  ;;  %v1572_v5 = vld [vmem:[#allocation2 + $0x120] ss:$8 sps:$4 sm:$0xff]   ;;  %v1573_v6 = vld [vmem:[#allocation2 + $0x134] ss:$8 sps:$4 sm:$0xff]   ;;  %v1575_v7 = vld [vmem:[#allocation2 + $0x130] ss:$8 sps:$4 sm:$0xff]  }
  0x29   :  { %804 = vmatprep.subr.bf16.mxu0 %v1567_v2  ;;  %v1576_v8 = vld [vmem:[#allocation2 + $0x144] ss:$8 sps:$4 sm:$0xff]   ;;  %v1863_v9 = vmov 1983009808   ;;  %v1578_v12 = vld [vmem:[#allocation2 + $0x140] ss:$8 sps:$4 sm:$0xff]  }
  0x2a   :  { %v77_v10 = vunpack.c.l.s4 %v1863_v9  ;;  %v1579_v13 = vld [vmem:[#allocation2 + $0x154] ss:$8 sps:$4 sm:$0xff]   ;;  %v1932_v15 = vshrl.u32 %v79_v11, 7  ;;  %v1581_v16 = vld [vmem:[#allocation2 + $0x150] ss:$8 sps:$4 sm:$0xff]   ;;  %vm757_vm0 = vcmask 130048  }
  0x2b   :  { %v1582_v17 = vld [vmem:[#allocation2 + $0x164] ss:$8 sps:$4 sm:$0xff]   ;;  %v1584_v19 = vld [vmem:[#allocation2 + $0x160] ss:$8 sps:$4 sm:$0xff]   ;;  %v1585_v22 = vld [vmem:[#allocation2 + $0x174] ss:$8 sps:$4 sm:$0xff]  }
  0x2c   :  { %805 = vmatpush1.bf16.msra.mxu0 %v1569_v3  ;;  %v78_v14 = vunpack.c.0.s8 %v77_v10  ;;  %v1612_v20 = vld [vmem:[%s2056_s0 + $0x4] ss:$14 sps:$4 sm:$0xff]   ;;  %v1614_v21 = vld [vmem:[%s2056_s0 + $0x20] ss:$14 sps:$4 sm:$0xff]   ;;  %vm1353_vm1 = vcmask 80896  }
  0x2d   :  { %806 = vmatprep.subr.bf16.mxu0 %v1570_v4  ;;  %v1622_v25 = vld [vmem:[#allocation2 + $0x4] ss:$8 sps:$4 sm:$0xff]   ;;  %v1587_v26 = vld [vmem:[#allocation2 + $0x170] ss:$8 sps:$4 sm:$0xff]   ;;  %v1627_v29 = vld [vmem:[#allocation2] ss:$8 sps:$4 sm:$0xff]  }
  0x2e   :  { %v1935_v18 = vsub.s32 %v78_v14, %v1932_v15  ;;  %v1588_v28 = vld [vmem:[#allocation2 + $0x184] ss:$8 sps:$4 sm:$0xff]   ;;  %761 = vmatprep.subr.bf16.mxu1 %v1622_v25  ;;  %v1628_v31 = vld [vmem:[#allocation2 + $0x14] ss:$8 sps:$4 sm:$0xff]   ;;  %v1590_v32 = vld [vmem:[#allocation2 + $0x180] ss:$8 sps:$4 sm:$0xff]  }
  0x2f   :  { %v1591_v33 = vld [vmem:[#allocation2 + $0x194] ss:$8 sps:$4 sm:$0xff]   ;;  %762 = vmatpush1.bf16.msra.mxu1 %v1627_v29  ;;  %v1633_v34 = vld [vmem:[#allocation2 + $0x10] ss:$8 sps:$4 sm:$0xff]   ;;  %v1634_v35 = vld [vmem:[#allocation2 + $0x24] ss:$8 sps:$4 sm:$0xff]  }
  0x30   :  { %807 = vmatpush1.bf16.msra.mxu0 %v1572_v5  ;;  %v1944_v23 = vrot.slane %v1612_v20, %v1935_v18  ;;  %v1947_v24 = vrot.slane %v1614_v21, %v1935_v18  ;;  %763 = vmatprep.subr.bf16.mxu1 %v1628_v31  ;;  %v1593_v36 = vld [vmem:[#allocation2 + $0x190] ss:$8 sps:$4 sm:$0xff]   ;;  %v1639_v37 = vld [vmem:[#allocation2 + $0x20] ss:$8 sps:$4 sm:$0xff]   ;;  %v1640_v38 = vld [vmem:[#allocation2 + $0x34] ss:$8 sps:$4 sm:$0xff]  }
  0x31   :  { %808 = vmatprep.subr.bf16.mxu0 %v1573_v6  ;;  %v1594_v39 = vld [vmem:[#allocation2 + $0x1a4] ss:$8 sps:$4 sm:$0xff]   ;;  %v1596_v40 = vld [vmem:[#allocation2 + $0x1a0] ss:$8 sps:$4 sm:$0xff]   ;;  %v1645_v41 = vld [vmem:[#allocation2 + $0x30] ss:$8 sps:$4 sm:$0xff]  }
  0x32   :  { %v107_v27 = vcombine.high %v1944_v23, %v1947_v24  ;;  %v1646_v42 = vld [vmem:[#allocation2 + $0x44] ss:$8 sps:$4 sm:$0xff]   ;;  %v1597_v43 = vld [vmem:[#allocation2 + $0x1b4] ss:$8 sps:$4 sm:$0xff]   ;;  %v1599_v44 = vld [vmem:[#allocation2 + $0x1b0] ss:$8 sps:$4 sm:$0xff]   ;;  %v106_v61 = vcombine.low %v1944_v23, %v1947_v24 }
  0x33   :  { %764 = vmatpush1.bf16.msra.mxu1 %v1633_v34  ;;  %v1651_v45 = vld [vmem:[#allocation2 + $0x40] ss:$8 sps:$4 sm:$0xff]   ;;  %v1652_v46 = vld [vmem:[#allocation2 + $0x54] ss:$8 sps:$4 sm:$0xff]   ;;  %v1600_v47 = vld [vmem:[#allocation2 + $0x1c4] ss:$8 sps:$4 sm:$0xff]  }
  0x34   :  { %809 = vmatpush1.bf16.msra.mxu0 %v1575_v7  ;;  %v153_v30 = vpack.c.bf16 %v107_v27, %v107_v27  ;;  %765 = vmatprep.subr.bf16.mxu1 %v1634_v35  ;;  %v1602_v48 = vld [vmem:[#allocation2 + $0x1c0] ss:$8 sps:$4 sm:$0xff]   ;;  %v1657_v49 = vld [vmem:[#allocation2 + $0x50] ss:$8 sps:$4 sm:$0xff]   ;;  %v1658_v50 = vld [vmem:[#allocation2 + $0x64] ss:$8 sps:$4 sm:$0xff]   ;;  %v152_v2 = vpack.c.bf16 %v106_v61, %v106_v61 }
  0x35   :  { %810 = vmatprep.subr.bf16.mxu0 %v1576_v8  ;;  %v1603_v51 = vld [vmem:[#allocation2 + $0x1d4] ss:$8 sps:$4 sm:$0xff]   ;;  %v1605_v52 = vld [vmem:[#allocation2 + $0x1d0] ss:$8 sps:$4 sm:$0xff]   ;;  %v1663_v53 = vld [vmem:[#allocation2 + $0x60] ss:$8 sps:$4 sm:$0xff]  }
  0x36   :  { %834 = vmatprep.mubr.bf16.mxu0 %v153_v30  ;;  %v1664_v54 = vld [vmem:[#allocation2 + $0x74] ss:$8 sps:$4 sm:$0xff]   ;;  %v1606_v55 = vld [vmem:[#allocation2 + $0x1e4] ss:$8 sps:$4 sm:$0xff]   ;;  %v1608_v56 = vld [vmem:[#allocation2 + $0x1e0] ss:$8 sps:$4 sm:$0xff]  }
  0x37   :  { %766 = vmatpush1.bf16.msra.mxu1 %v1639_v37  ;;  %v1669_v57 = vld [vmem:[#allocation2 + $0x70] ss:$8 sps:$4 sm:$0xff]   ;;  %v1670_v58 = vld [vmem:[#allocation2 + $0x84] ss:$8 sps:$4 sm:$0xff]   ;;  %v1609_v59 = vld [vmem:[#allocation2 + $0x1f4] ss:$8 sps:$4 sm:$0xff]  }
  0x38   :  { %811 = vmatpush1.bf16.msra.mxu0 %v1578_v12  ;;  %767 = vmatprep.subr.bf16.mxu1 %v1640_v38  ;;  %v1611_v60 = vld [vmem:[#allocation2 + $0x1f0] ss:$8 sps:$4 sm:$0xff]   ;;  %v1675_v62 = vld [vmem:[#allocation2 + $0x80] ss:$8 sps:$4 sm:$0xff]   ;;  %v1676_v63 = vld [vmem:[#allocation2 + $0x94] ss:$8 sps:$4 sm:$0xff]  }
  0x39   :  { %812 = vmatprep.subr.bf16.mxu0 %v1579_v13  ;;  %v1618_v0 = vld [vmem:[#allocation2 + $0x204] ss:$8 sps:$4 sm:$0xff]   ;;  %v1616_v1 = vld [vmem:[#allocation2 + $0x200] ss:$8 sps:$4 sm:$0xff]   ;;  %v1621_v3 = vld [vmem:[#allocation2 + $0x214] ss:$8 sps:$4 sm:$0xff]  }
  0x3a   :  { %v1681_v4 = vld [vmem:[#allocation2 + $0x90] ss:$8 sps:$4 sm:$0xff]   ;;  %v1682_v5 = vld [vmem:[#allocation2 + $0xa4] ss:$8 sps:$4 sm:$0xff]   ;;  %v1687_v9 = vld [vmem:[#allocation2 + $0xa0] ss:$8 sps:$4 sm:$0xff]  }
  0x3b   :  { %768 = vmatpush1.bf16.msra.mxu1 %v1645_v41  ;;  %v1706_v6 = vld [vmem:[%s2056_s0 + $0x8] ss:$14 sps:$4 sm:$0xff]   ;;  %v1709_v7 = vld [vmem:[%s2056_s0 + $0x24] ss:$14 sps:$4 sm:$0xff]  }
  0x3c   :  { %813 = vmatpush1.bf16.msra.mxu0 %v1581_v16  ;;  %769 = vmatprep.subr.bf16.mxu1 %v1646_v42  ;;  %v1619_v8 = vld [vmem:[#allocation2 + $0x210] ss:$8 sps:$4 sm:$0xff]   ;;  %v1960_v10 = vrot.slane %v1706_v6, %v1935_v18  ;;  %v1688_v11 = vld [vmem:[#allocation2 + $0xb4] ss:$8 sps:$4 sm:$0xff]   ;;  %v1963_v12 = vrot.slane %v1709_v7, %v1935_v18  ;;  %v1626_v13 = vld [vmem:[#allocation2 + $0x224] ss:$8 sps:$4 sm:$0xff]  }
  0x3d   :  { %814 = vmatprep.subr.bf16.mxu0 %v1582_v17  ;;  %v1693_v14 = vld [vmem:[#allocation2 + $0xb0] ss:$8 sps:$4 sm:$0xff]   ;;  %v1624_v20 = vld [vmem:[#allocation2 + $0x220] ss:$8 sps:$4 sm:$0xff]   ;;  %v1694_v21 = vld [vmem:[#allocation2 + $0xc4] ss:$8 sps:$4 sm:$0xff]  }
  0x3e   :  { %v141_v16 = vcombine.high %v1960_v10, %v1963_v12  ;;  %v1721_v17 = vld [vmem:[%s2056_s0] ss:$14 sps:$4 sm:$0xff]   ;;  %v1632_v23 = vld [vmem:[#allocation2 + $0x234] ss:$8 sps:$4 sm:$0xff]  }
  0x3f   :  { %770 = vmatpush1.bf16.msra.mxu1 %v1651_v45  ;;  %v82_v24 = vrot.slane %v1721_v17, %v1935_v18  ;;  %v1700_v29 = vld [vmem:[#allocation2 + $0xd4] ss:$8 sps:$4 sm:$0xff]   ;;  %v1638_v30 = vld [vmem:[#allocation2 + $0x244] ss:$8 sps:$4 sm:$0xff]   ;;  %v1642_v37 = vld [vmem:[#allocation2 + $0x250] ss:$8 sps:$4 sm:$0xff]   ;;  %v140_v17 = vcombine.low %v1960_v10, %v1963_v12 }
  0x40   :  { %815 = vmatpush1.bf16.msra.mxu0 %v1584_v19  ;;  %771 = vmatprep.subr.bf16.mxu1 %v1652_v46  ;;  %v1722_v19 = vld [vmem:[%s2056_s0 + $0x1c] ss:$14 sps:$4 sm:$0xff]   ;;  %v1720_v42 = vld [vmem:[#allocation2 + $0xf0] ss:$8 sps:$4 sm:$0xff]  }
  0x41   :  { %816 = vmatprep.subr.bf16.mxu0 %v1585_v22  ;;  %v155_v22 = vpack.c.bf16 %v141_v16, %v141_v16  ;;  %v96_v25 = vrot.slane %v1722_v19, %v1935_v18  ;;  %v1712_v34 = vld [vmem:[#allocation2 + $0xe4] ss:$8 sps:$4 sm:$0xff]   ;;  %v1644_v35 = vld [vmem:[#allocation2 + $0x254] ss:$8 sps:$4 sm:$0xff]   ;;  %v1648_v41 = vld [vmem:[#allocation2 + $0x260] ss:$8 sps:$4 sm:$0xff]  }
  0x42   :  { %v1718_v38 = vld [vmem:[#allocation2 + $0xf4] ss:$8 sps:$4 sm:$0xff]   ;;  %v1723_v45 = vld [vmem:[#allocation5] ss:$8 sps:$4 sm:$0xff]   ;;  %v1714_v10 = vld [vmem:[#allocation2 + $0x300] ss:$8 sps:$4 sm:$0xff]  }
  0x43   :  { %772 = vmatpush1.bf16.msra.mxu1 %v1657_v49  ;;  %v105_v27 = vcombine.high %v82_v24, %v96_v25  ;;  %v1654_v46 = vld [vmem:[#allocation2 + $0x270] ss:$8 sps:$4 sm:$0xff]   ;;  %v1662_v49 = vld [vmem:[#allocation2 + $0x284] ss:$8 sps:$4 sm:$0xff]   ;;  %v1680_v61 = vld [vmem:[#allocation2 + $0x2b4] ss:$8 sps:$4 sm:$0xff]  }
  0x44   :  { %817 = vmatpush1.bf16.msra.mxu0 %v1587_v26  ;;  %773 = vmatprep.subr.bf16.mxu1 %v1658_v50  ;;  %v1699_v26 = vld [vmem:[#allocation2 + $0xc0] ss:$8 sps:$4 sm:$0xff]   ;;  %v1741_v6 = vld [vmem:[#allocation5 + $0x60] ss:$8 sps:$4 sm:$0xff]   ;;  %v1704_v16 = vld [vmem:[#allocation2 + $0x2f4] ss:$8 sps:$4 sm:$0xff]  }
  0x45   :  { %818 = vmatprep.subr.bf16.mxu0 %v1588_v28  ;;  %v1630_v28 = vld [vmem:[#allocation2 + $0x230] ss:$8 sps:$4 sm:$0xff]   ;;  %v151_v31 = vpack.c.bf16 %v105_v27, %v105_v27  ;;  %v1726_v50 = vld [vmem:[#allocation5 + $0x10] ss:$8 sps:$4 sm:$0xff]   ;;  %v1755_v12 = vld [vmem:[#allocation5 + $0xa4] ss:$8 sps:$4 sm:$0xff]  }
  0x46   :  { %v1690_v7 = vld [vmem:[#allocation2 + $0x2d0] ss:$8 sps:$4 sm:$0xff]  }
  0x47   :  { %774 = vmatpush1.bf16.msra.mxu1 %v1663_v53  ;;  %793 = vmatprep.mubr.bf16.mxu1 %v151_v31  ;;  %v1668_v53 = vld [vmem:[#allocation2 + $0x294] ss:$8 sps:$4 sm:$0xff]   ;;  %v1747_v19 = vld [vmem:[#allocation5 + $0x80] ss:$8 sps:$4 sm:$0xff]   ;;  %v1758_v31 = vld [vmem:[#allocation5 + $0xb4] ss:$8 sps:$4 sm:$0xff]  }
  0x48   :  { %819 = vmatpush1.bf16.msra.mxu0 %v1590_v32  ;;  %775 = vmatprep.subr.bf16.mxu1 %v1664_v54  ;;  %v1705_v32 = vld [vmem:[#allocation2 + $0xd0] ss:$8 sps:$4 sm:$0xff]  }
  0x49   :  { %820 = vmatprep.subr.bf16.mxu0 %v1591_v33  ;;  %v1636_v33 = vld [vmem:[#allocation2 + $0x240] ss:$8 sps:$4 sm:$0xff]   ;;  %v1729_v54 = vld [vmem:[#allocation5 + $0x20] ss:$8 sps:$4 sm:$0xff]  }
  0x4b   :  { %776 = vmatpush1.bf16.msra.mxu1 %v1669_v57  ;;  %v1674_v57 = vld [vmem:[#allocation2 + $0x2a4] ss:$8 sps:$4 sm:$0xff]  }
  0x4c   :  { %821 = vmatpush1.bf16.msra.mxu0 %v1593_v36  ;;  %777 = vmatprep.subr.bf16.mxu1 %v1670_v58  ;;  %v1717_v36 = vld [vmem:[#allocation2 + $0xe0] ss:$8 sps:$4 sm:$0xff]  }
  0x4d   :  { %822 = vmatprep.subr.bf16.mxu0 %v1594_v39  ;;  %v1650_v39 = vld [vmem:[#allocation2 + $0x264] ss:$8 sps:$4 sm:$0xff]   ;;  %v1732_v58 = vld [vmem:[#allocation5 + $0x30] ss:$8 sps:$4 sm:$0xff]  }
  0x4f   :  { %778 = vmatpush1.bf16.msra.mxu1 %v1675_v62  ;;  %v1735_v62 = vld [vmem:[#allocation5 + $0x40] ss:$8 sps:$4 sm:$0xff]  }
  0x50   :  { %823 = vmatpush1.bf16.msra.mxu0 %v1596_v40  ;;  %779 = vmatprep.subr.bf16.mxu1 %v1676_v63  ;;  %v104_v40 = vcombine.low %v82_v24, %v96_v25  ;;  %v1678_v63 = vld [vmem:[#allocation2 + $0x2b0] ss:$8 sps:$4 sm:$0xff]   ;;  %v1711_v24 = vld [vmem:[%s2056_s0 + $0x28] ss:$14 sps:$4 sm:$0x33]   ;;  %v154_v25 = vpack.c.bf16 %v140_v17, %v140_v17 }
  0x51   :  { %824 = vmatprep.subr.bf16.mxu0 %v1597_v43  ;;  %v1656_v43 = vld [vmem:[#allocation2 + $0x274] ss:$8 sps:$4 sm:$0xff]   ;;  %v961_v17 = vld [vmem:[%s2060_s4] sm:$0x3] }
  0x53   :  { %780 = vmatpush1.bf16.msra.mxu1 %v1681_v4  ;;  %v1743_v4 = vld [vmem:[#allocation5 + $0x64] ss:$8 sps:$4 sm:$0xff]  }
  0x54   :  { %825 = vmatpush1.bf16.msra.mxu0 %v1599_v44  ;;  %781 = vmatprep.subr.bf16.mxu1 %v1682_v5  ;;  %v1725_v44 = vld [vmem:[#allocation5 + $0x4] ss:$8 sps:$4 sm:$0xff]  }
  0x55   :  { %826 = vmatprep.subr.bf16.mxu0 %v1600_v47  ;;  %v150_v47 = vpack.c.bf16 %v104_v40, %v104_v40  ;;  %v1692_v5 = vld [vmem:[#allocation2 + $0x2d4] ss:$8 sps:$4 sm:$0xff]   ;;  %v1770_v40 = vld [vmem:[#allocation5 + $0xf4] ss:$8 sps:$4 sm:$0xff]  }
  0x57   :  { %782 = vmatpush1.bf16.msra.mxu1 %v1687_v9  ;;  %v1698_v9 = vld [vmem:[#allocation2 + $0x2e4] ss:$8 sps:$4 sm:$0xff]  }
  0x58   :  { %827 = vmatpush1.bf16.msra.mxu0 %v1602_v48  ;;  %783 = vmatprep.subr.bf16.mxu1 %v1688_v11  ;;  %v1728_v48 = vld [vmem:[#allocation5 + $0x14] ss:$8 sps:$4 sm:$0xff]   ;;  %v1744_v11 = vld [vmem:[#allocation5 + $0x70] ss:$8 sps:$4 sm:$0xff]  }
  0x59   :  { %828 = vmatprep.subr.bf16.mxu0 %v1603_v51  ;;  %v1660_v51 = vld [vmem:[#allocation2 + $0x280] ss:$8 sps:$4 sm:$0xff]  }
  0x5b   :  { %784 = vmatpush1.bf16.msra.mxu1 %v1693_v14  ;;  %v1749_v14 = vld [vmem:[#allocation5 + $0x84] ss:$8 sps:$4 sm:$0xff]  }
  0x5c   :  { %829 = vmatpush1.bf16.msra.mxu0 %v1605_v52  ;;  %785 = vmatprep.subr.bf16.mxu1 %v1694_v21  ;;  %v1731_v52 = vld [vmem:[#allocation5 + $0x24] ss:$8 sps:$4 sm:$0xff]   ;;  %v1752_v21 = vld [vmem:[#allocation5 + $0x94] ss:$8 sps:$4 sm:$0xff]  }
  0x5d   :  { %830 = vmatprep.subr.bf16.mxu0 %v1606_v55  ;;  %v1666_v55 = vld [vmem:[#allocation2 + $0x290] ss:$8 sps:$4 sm:$0xff]  }
  0x5f   :  { %786 = vmatpush1.bf16.msra.mxu1 %v1699_v26  ;;  %v1750_v26 = vld [vmem:[#allocation5 + $0x90] ss:$8 sps:$4 sm:$0xff]  }
  0x60   :  { %831 = vmatpush1.bf16.msra.mxu0 %v1608_v56  ;;  %787 = vmatprep.subr.bf16.mxu1 %v1700_v29  ;;  %v1734_v56 = vld [vmem:[#allocation5 + $0x34] ss:$8 sps:$4 sm:$0xff]   ;;  %v1753_v29 = vld [vmem:[#allocation5 + $0xa0] ss:$8 sps:$4 sm:$0xff]  }
  0x61   :  { %832 = vmatprep.subr.bf16.mxu0 %v1609_v59  ;;  %v1672_v59 = vld [vmem:[#allocation2 + $0x2a0] ss:$8 sps:$4 sm:$0xff]  }
  0x63   :  { %788 = vmatpush1.bf16.msra.mxu1 %v1705_v32 }
  0x64   :  { %833 = vmatpush1.bf16.msra.mxu0 %v1611_v60  ;;  %789 = vmatprep.subr.bf16.mxu1 %v1712_v34  ;;  %v1737_v60 = vld [vmem:[#allocation5 + $0x44] ss:$8 sps:$4 sm:$0xff]  }
  0x65   :  { %843 = vmatprep.subr.bf16.mxu0 %v1618_v0  ;;  %v1740_v0 = vld [vmem:[#allocation5 + $0x54] ss:$8 sps:$4 sm:$0xff]   ;;  %v1761_v34 = vld [vmem:[#allocation5 + $0xc4] ss:$8 sps:$4 sm:$0xff]  }
  0x67   :  { %835 = vmatmul.mubr.bf16.vlgmr.msra.gmra.mrb[0].mxu0 %v152_v2  ;;  %790 = vmatpush1.bf16.msra.mxu1 %v1717_v36  ;;  %v1738_v2 = vld [vmem:[#allocation5 + $0x50] ss:$8 sps:$4 sm:$0xff]   ;;  %v1759_v36 = vld [vmem:[#allocation5 + $0xc0] ss:$8 sps:$4 sm:$0xff]  }
  0x68   :  { %844 = vmatpush1.bf16.msra.mxu0 %v1616_v1  ;;  %875 = vmatprep.mubr.bf16.mxu0 %v155_v22  ;;  %v1686_v1 = vld [vmem:[#allocation2 + $0x2c4] ss:$8 sps:$4 sm:$0xff]  }
  0x69   :  { %845 = vmatprep.subr.bf16.mxu0 %v1621_v3  ;;  %791 = vmatprep.subr.bf16.mxu1 %v1718_v38  ;;  %v1684_v3 = vld [vmem:[#allocation2 + $0x2c0] ss:$8 sps:$4 sm:$0xff]   ;;  %v1716_v22 = vld [vmem:[#allocation2 + $0x304] ss:$8 sps:$4 sm:$0xff]   ;;  %v1767_v38 = vld [vmem:[#allocation5 + $0xe4] ss:$8 sps:$4 sm:$0xff]  }
  0x6b   :  { %792 = vmatpush1.bf16.msra.mxu1 %v1720_v42  ;;  %v1771_v42 = vld [vmem:[%s2061_s5 + $0x40] sm:$0xff]  }
  0x6c   :  { %846 = vmatpush1.bf16.msra.mxu0 %v1619_v8  ;;  %1133 = vmatprep.subr.bf16.mxu1 %v1725_v44  ;;  %v1746_v8 = vld [vmem:[#allocation5 + $0x74] ss:$8 sps:$4 sm:$0xff]  }
  0x6d   :  { %847 = vmatprep.subr.bf16.mxu0 %v1626_v13  ;;  %v1696_v13 = vld [vmem:[#allocation2 + $0x2e0] ss:$8 sps:$4 sm:$0xff]  }
  0x6e   :  { %794 = vmatmul.mubr.bf16.vlgmr.msra.gmra.mrb[0].mxu1 %v150_v47  ;;  %v259_v47 = vsub.s32 0, %v1932_v15 }
  0x6f   :  { %1134 = vmatpush1.bf16.msra.mxu1 %v1723_v45 }
  0x70   :  { %848 = vmatpush1.bf16.msra.mxu0 %v1624_v20  ;;  %1135 = vmatprep.subr.bf16.mxu1 %v1728_v48  ;;  %v1702_v20 = vld [vmem:[#allocation2 + $0x2f0] ss:$8 sps:$4 sm:$0xff]   ;;  %v255_v48 = vld [vmem:[%s2058_s2] sm:$0x3] }
  0x71   :  { %849 = vmatprep.subr.bf16.mxu0 %v1632_v23  ;;  %v1708_v23 = vld [vmem:[%s2056_s0 + $0xc] ss:$14 sps:$4 sm:$0x33]  }
  0x72   :  { %v125_v27 = vrot.slane %v1708_v23, %v1935_v18 }
  0x73   :  { %1136 = vmatpush1.bf16.msra.mxu1 %v1726_v50  ;;  %v260_v50 = vrot.slane %v255_v48, %v259_v47 }
  0x74   :  { %850 = vmatpush1.bf16.msra.mxu0 %v1630_v28  ;;  %1137 = vmatprep.subr.bf16.mxu1 %v1731_v52  ;;  %v139_v28 = vrot.slane %v1711_v24, %v1935_v18  ;;  %v1762_v18 = vld [vmem:[#allocation5 + $0xd0] ss:$8 sps:$4 sm:$0xff]  }
  0x75   :  { %851 = vmatprep.subr.bf16.mxu0 %v1638_v30  ;;  %v1864_v30 = vmov 0  }
  0x76   :  { %v142_v32 = vcombine.low %v125_v27, %v139_v28 }
  0x77   :  { %1138 = vmatpush1.bf16.msra.mxu1 %v1729_v54 }
  0x78   :  { %852 = vmatpush1.bf16.msra.mxu0 %v1636_v33  ;;  %1139 = vmatprep.subr.bf16.mxu1 %v1734_v56  ;;  %v1756_v33 = vld [vmem:[#allocation5 + $0xb0] ss:$8 sps:$4 sm:$0xff]  }
  0x79   :  { %853 = vmatprep.subr.bf16.mxu0 %v1644_v35  ;;  %v156_v35 = vpack.c.bf16 %v142_v32, %v142_v32 }
  0x7b   :  { %1140 = vmatpush1.bf16.msra.mxu1 %v1732_v58 }
  0x7c   :  { %854 = vmatpush1.bf16.msra.mxu0 %v1642_v37  ;;  %1141 = vmatprep.subr.bf16.mxu1 %v1737_v60  ;;  %v1764_v37 = vld [vmem:[#allocation5 + $0xd4] ss:$8 sps:$4 sm:$0xff]  }
  0x7d   :  { %855 = vmatprep.subr.bf16.mxu0 %v1650_v39  ;;  %v1765_v39 = vld [vmem:[#allocation5 + $0xe0] ss:$8 sps:$4 sm:$0xff]  }
  0x7f   :  { %1142 = vmatpush1.bf16.msra.mxu1 %v1735_v62 }
  0x80   :  { %856 = vmatpush1.bf16.msra.mxu0 %v1648_v41  ;;  %1143 = vmatprep.subr.bf16.mxu1 %v1740_v0  ;;  %v1768_v41 = vld [vmem:[#allocation5 + $0xf0] ss:$8 sps:$4 sm:$0xff]  }
  0x81   :  { %857 = vmatprep.subr.bf16.mxu0 %v1656_v43 }
  0x83   :  { %1144 = vmatpush1.bf16.msra.mxu1 %v1738_v2  ;;  %v1775_v2 = vld [vmem:[%s2061_s5 + $0x50] sm:$0xff]  }
  0x84   :  { %858 = vmatpush1.bf16.msra.mxu0 %v1654_v46  ;;  %1145 = vmatprep.subr.bf16.mxu1 %v1743_v4  ;;  %v1777_v4 = vld [vmem:[%s2061_s5 + $0x58] sm:$0xff]  }
  0x85   :  { %859 = vmatprep.subr.bf16.mxu0 %v1662_v49  ;;  %v263_v49 = vsub.s32 1, %v1932_v15  ;;  %v1773_v15 = vld [vmem:[%s2061_s5 + $0x48] sm:$0xff]  }
  0x87   :  { %1146 = vmatpush1.bf16.msra.mxu1 %v1741_v6  ;;  %v1779_v6 = vld [vmem:[%s2061_s5 + $0x60] sm:$0xff]  }
  0x88   :  { %860 = vmatpush1.bf16.msra.mxu0 %v1660_v51  ;;  %1147 = vmatprep.subr.bf16.mxu1 %v1746_v8  ;;  %v264_v51 = vrot.slane %v255_v48, %v263_v49  ;;  %v1781_v8 = vld [vmem:[%s2061_s5 + $0x68] sm:$0xff]  }
  0x89   :  { %861 = vmatprep.subr.bf16.mxu0 %v1668_v53 }
  0x8b   :  { %1148 = vmatpush1.bf16.msra.mxu1 %v1744_v11  ;;  %v1783_v11 = vld [vmem:[%s2061_s5 + $0x70] sm:$0xff]  }
  0x8c   :  { %862 = vmatpush1.bf16.msra.mxu0 %v1666_v55  ;;  %1149 = vmatprep.subr.bf16.mxu1 %v1749_v14  ;;  %v1785_v14 = vld [vmem:[%s2061_s5 + $0x78] sm:$0xff]  }
  0x8d   :  { %863 = vmatprep.subr.bf16.mxu0 %v1674_v57 }
  0x8f   :  { %1150 = vmatpush1.bf16.msra.mxu1 %v1747_v19  ;;  %v966_v19 = vrot.slane %v961_v17, %v259_v47 }
  0x90   :  { %864 = vmatpush1.bf16.msra.mxu0 %v1672_v59  ;;  %1151 = vmatprep.subr.bf16.mxu1 %v1752_v21 }
  0x91   :  { %865 = vmatprep.subr.bf16.mxu0 %v1680_v61 }
  0x93   :  { %1152 = vmatpush1.bf16.msra.mxu1 %v1750_v26 }
  0x94   :  { %866 = vmatpush1.bf16.msra.mxu0 %v1678_v63  ;;  %1153 = vmatprep.subr.bf16.mxu1 %v1755_v12  ;;  %v1772_v63 = vld [vmem:[%s2061_s5] sm:$0xff]  }
  0x95   :  { %867 = vmatprep.subr.bf16.mxu0 %v1686_v1  ;;  %v1774_v1 = vld [vmem:[%s2061_s5 + $0x8] sm:$0xff]  }
  0x97   :  { %1154 = vmatpush1.bf16.msra.mxu1 %v1753_v29 }
  0x98   :  { %868 = vmatpush1.bf16.msra.mxu0 %v1684_v3  ;;  %1155 = vmatprep.subr.bf16.mxu1 %v1758_v31  ;;  %v1776_v3 = vld [vmem:[%s2061_s5 + $0x10] sm:$0xff]  }
  0x99   :  { %869 = vmatprep.subr.bf16.mxu0 %v1692_v5  ;;  %v1778_v5 = vld [vmem:[%s2061_s5 + $0x18] sm:$0xff]  }
  0x9b   :  { %1156 = vmatpush1.bf16.msra.mxu1 %v1756_v33 }
  0x9c   :  { %870 = vmatpush1.bf16.msra.mxu0 %v1690_v7  ;;  %1157 = vmatprep.subr.bf16.mxu1 %v1761_v34  ;;  %v1780_v7 = vld [vmem:[%s2061_s5 + $0x20] sm:$0xff]  }
  0x9d   :  { %871 = vmatprep.subr.bf16.mxu0 %v1698_v9  ;;  %v1782_v9 = vld [vmem:[%s2061_s5 + $0x28] sm:$0xff]  }
  0x9f   :  { %1158 = vmatpush1.bf16.msra.mxu1 %v1759_v36 }
  0xa0   :  { %872 = vmatpush1.bf16.msra.mxu0 %v1696_v13  ;;  %1159 = vmatprep.subr.bf16.mxu1 %v1764_v37  ;;  %v1784_v13 = vld [vmem:[%s2061_s5 + $0x30] sm:$0xff]  }
  0xa1   :  { %873 = vmatprep.subr.bf16.mxu0 %v1704_v16  ;;  %v1786_v16 = vld [vmem:[%s2061_s5 + $0x38] sm:$0xff]  }
  0xa3   :  { %1160 = vmatpush1.bf16.msra.mxu1 %v1762_v18 }
  0xa4   :  { %874 = vmatpush1.bf16.msra.mxu0 %v1702_v20  ;;  %1161 = vmatprep.subr.bf16.mxu1 %v1767_v38  ;;  %v970_v20 = vrot.slane %v961_v17, %v263_v49 }
  0xa5   :  { %884 = vmatprep.subr.bf16.mxu0 %v1716_v22 }
  0xa7   :  { %876 = vmatmul.mubr.bf16.vlgmr.msra.gmra.mrb[0].mxu0 %v154_v25  ;;  %1162 = vmatpush1.bf16.msra.mxu1 %v1765_v39 }
  0xa8   :  { %885 = vmatpush1.bf16.msra.mxu0 %v1714_v10  ;;  %916 = vmatprep.mubr.bf16.mxu0 %v1864_v30  ;;  %v1504_v30 = vld [vmem:[%s2062_s6] ss:$0 sm:$0xff] }
  0xa9   :  { %1163 = vmatprep.subr.bf16.mxu1 %v1770_v40 }
  0xab   :  { %1164 = vmatpush1.bf16.msra.mxu1 %v1768_v41 }
  0xac   :  { %1521 = vmatprep.subr.bf16.mxu1 %v1771_v42 }
  0xb3   :  { %1471 = vmatmul.mubr.msk.bf16.vlgmr.msra.gmra.mrb[0].mxu0 %vm757_vm0, %v156_v35 }
 0x141   :  { %v795_v43 = vpop.f32.mrb[0].mxu1 }
 0x142   :  { %v797_v44 = vpop.f32.mrb[1].mxu1  ;;  %v796_v52 = vadd.f32 %v795_v43, %v260_v50 }
 0x143   :  { %v799_v45 = vpop.f32.mrb[2].mxu1  ;;  %v798_v53 = vadd.f32 %v797_v44, %v264_v51 }
 0x144   :  { %v800_v46 = vpop.f32.mrb[3].mxu1 }
 0x186   :  { %v918_v54 = vpop.f32.mrb[0].mxu0 }
 0x187   :  { %v1544_v55 = vadd.f32 %v918_v54, %v796_v52  ;;  %v920_v56 = vpop.f32.mrb[1].mxu0 }
 0x188   :  { %v1546_v57 = vadd.f32 %v920_v56, %v798_v53  ;;  %v922_v58 = vpop.f32.mrb[2].mxu0 }
 0x189   :  { %v925_v59 = vmax.f32 %v1544_v55, 0.0  ;;  %v923_v60 = vpop.f32.mrb[3].mxu0 }
 0x18a   :  { %v926_v61 = vmax.f32 %v1546_v57, 0.0 }
 0x18b   :  { %v927_v0 = vpack.c.bf16 %v925_v59, %v925_v59 }
 0x18c   :  { %v928_v62 = vpack.c.bf16 %v926_v61, %v926_v61 }
 0x18e   :  { %1165 = vmatprep.mubr.bf16.mxu1 %v928_v62 }
 0x18f   :  { %1166 = vmatmul.mubr.bf16.vlgmr.msra.gmra.mrb[4].mxu1 %v927_v0 }
 0x190   :  { %1522 = vmatpush3.bf16.msra.mxu1 %v1772_v63 }
 0x191   :  { %1523 = vmatprep.subr.bf16.mxu1 %v1773_v15 }
 0x194   :  { %1524 = vmatpush3.bf16.msra.mxu1 %v1774_v1 }
 0x195   :  { %1525 = vmatprep.subr.bf16.mxu1 %v1775_v2 }
 0x198   :  { %1526 = vmatpush3.bf16.msra.mxu1 %v1776_v3 }
 0x199   :  { %1527 = vmatprep.subr.bf16.mxu1 %v1777_v4 }
 0x19c   :  { %1528 = vmatpush3.bf16.msra.mxu1 %v1778_v5 }
 0x19d   :  { %1529 = vmatprep.subr.bf16.mxu1 %v1779_v6 }
 0x1a0   :  { %1530 = vmatpush3.bf16.msra.mxu1 %v1780_v7 }
 0x1a1   :  { %1531 = vmatprep.subr.bf16.mxu1 %v1781_v8 }
 0x1a4   :  { %1532 = vmatpush3.bf16.msra.mxu1 %v1782_v9 }
 0x1a5   :  { %1533 = vmatprep.subr.bf16.mxu1 %v1783_v11 }
 0x1a8   :  { %1534 = vmatpush3.bf16.msra.mxu1 %v1784_v13 }
 0x1a9   :  { %1535 = vmatprep.subr.bf16.mxu1 %v1785_v14 }
 0x1ac   :  { %1536 = vmatpush3.bf16.msra.mxu1 %v1786_v16 }
 0x262   :  { %v1167_v21 = vpop.f32.mrb[4].mxu1 }
 0x263   :  { %v1168_v22 = vadd.f32 %v1167_v21, %v966_v19  ;;  %v1169_v23 = vpop.f32.mrb[5].mxu1 }
 0x264   :  { %v1170_v24 = vadd.f32 %v1169_v23, %v970_v20  ;;  %v1171_v25 = vpop.f32.mrb[6].mxu1 }
 0x265   :  { %v1174_v26 = vmax.f32 %v1168_v22, 0.0  ;;  %v1172_v10 = vpop.f32.mrb[7].mxu1 }
 0x266   :  { %v1175_v12 = vmax.f32 %v1170_v24, 0.0 }
 0x267   :  { %v1176_v28 = vpack.c.bf16 %v1174_v26, %v1174_v26 }
 0x268   :  { %v1177_v27 = vpack.c.bf16 %v1175_v12, %v1175_v12 }
 0x26a   :  { %1345 = vmatprep.mubr.bf16.mxu1 %v1177_v27 }
 0x26b   :  { %1346 = vmatmul.mubr.bf16.vlgmr.msra.gmra.mrb[8].mxu1 %v1176_v28 }
 0x33e   :  { %v1537_v29 = vpop.f32.mrb[8].mxu1 }
 0x33f   :  { %v1538_v31 = vpop.f32.mrb[9].mxu1 }
 0x340   :  { %v1539_v32 = vadd.f32 %v1538_v31, %v1537_v29  ;;  %v1540_v33 = vpop.f32.mrb[10].mxu1 }
 0x341   :  { %v1541_v34 = vpop.f32.mrb[11].mxu1 }
 0x342   :  { %v1348_v35 = vadd.f32 %v1539_v32, %v1504_v30 }
 0x344   :  { %1354 = vst.msk [vmem:[#allocation7] sm:$0xff] %vm1353_vm1, %v1348_v35 }
 0x345   :  { %1359 = vsyncadd [#allocation4], 96  ;;  %s1865_s4 = smov [#allocation7]  }
 0x346   :  { %s1360_s25 = sshll.u32 %s1865_s4, 4  ;;  %s1361_s25 = int_to_ptr.vmem [resolvable:$true] %s1360_s25 }
 0x347   :  { %s1831_s3 = scalar_lea.vmem %s1361_s25, 32  ;;  %s1835_s26 = scalar_lea.vmem %s1361_s25, 128 }
 0x348   :  { %p1832_p2 = scmp.ne.s32.totalorder %s1361_s25, %s1831_s3  ;;  %p1836_p3 = scmp.lt.s32.totalorder %s1361_s25, %s1361_s25 }
 0x349   :  { %p1837_p4 = scmp.lt.s32.totalorder %s1835_s26, %s1831_s3 }
 0x34b   :  { %p1838_p5 = por %p1837_p4, %p1836_p3 }
 0x34d   :  { %p1839_p6 = pnand %p1838_p5, %p1832_p2 }
 0x34f   :  { %1842 = shalt.err (!%p1839_p6)
}
 0x350   :  { %s1843_s28 = scalar_lea.hbm %s2063_s7, 32 }
 0x351   :  { %p1844_p7 = scmp.ne.s32.totalorder %s2063_s7, %s1843_s28  ;;  %p1847_p8 = scmp.lt.u32.totalorder %s1843_s28, %s2063_s7 }
 0x353   :  { %p1849_p9 = pnand %p1847_p8, %p1844_p7 }
 0x355   :  { %1852 = shalt.err (!%p1849_p9)
}
 0x356   :  { %s1866_s10 = smov 32   ;;  %s1867_s11 = smov 2  }
 0x357   :  { %1366 = dma.vmem_to_hbm [thread:$0]  %s1361_s25, 32, %s2063_s7, [#allocation4], %s1866_s10, %s1866_s10, %s1867_s11  }
 0x358   :  { %1857 = dma.done.wait [#allocation4], 128  }
 0x359   :  { %1858 = vsyncadd [#allocation4], 4294967168 }
 0x35a   :  { %1370 = vsyncpa [#allocation3], 1 }
 0x35b   :  { %1371 = vsyncpa [#allocation6], 1 }
 0x35c   :  { %1372 = vsyncpa [#allocation4], 1 }

</bundles_post_ra>
